<compile_context>
chip_gen: v7x
topology: tpu7x:2x2x1
jax: 0.10.0
libtpu: 0.0.40
codegen_flags: <defaults>
</compile_context>

<pallas_src>
import functools

import jax
import jax.numpy as jnp
from jax import lax
from jax.experimental import pallas as pl
from jax.experimental.pallas import tpu as pltpu


def _cust2_kernel(x_ref, o_ref, t1_ref, colsq_ref, *,
                  batch_size, block_rows, needs_mask):
    i = pl.program_id(0)
    nsteps = pl.num_programs(0)

    @pl.when(i == 0)
    def _init():
        t1_ref[...] = jnp.zeros_like(t1_ref)
        colsq_ref[...] = jnp.zeros_like(colsq_ref)

    # In-kernel upcast: stream native dtype (e.g. bf16) from HBM, math in f32.
    xf = x_ref[...].astype(jnp.float32)                      # (TB, T)

    def accumulate(row_valid):
        row_max = jnp.max(xf, axis=1, keepdims=True)         # (TB, 1)
        x_sq = xf * xf                                       # (TB, T)
        if row_valid is not None:
            # Validity is purely row-wise (padded rows of the ragged edge
            # block): mask the (TB,1) max result and zero padded rows of x_sq.
            row_max = jnp.where(row_valid, row_max, 0.0)
            x_sq = jnp.where(row_valid, x_sq, 0.0)
        t1_ref[...] += jnp.sum(row_max, axis=0, keepdims=True)    # (1, 1)
        colsq_ref[...] += jnp.sum(x_sq, axis=0, keepdims=True)    # (1, T)

    if needs_mask:
        # Clean fast path for all full blocks; mask path only on the last step.
        @pl.when(i < nsteps - 1)
        def _fast():
            accumulate(None)

        @pl.when(i == nsteps - 1)
        def _edge():
            row_ids = (lax.broadcasted_iota(jnp.int32, (block_rows, 1), 0)
                       + i * block_rows)
            accumulate(row_ids < batch_size)
    else:
        accumulate(None)

    @pl.when(i == nsteps - 1)
    def _finalize():
        o_ref[...] = t1_ref[...] - jnp.max(colsq_ref[...], axis=1, keepdims=True)


def _vmem_capacity_bytes() -> int:
    """Physical VMEM of the current chip, with conservative fallbacks."""
    try:
        cap = getattr(pltpu.get_tpu_info(), "vmem_capacity_bytes", None)
        if cap:
            return int(cap)
    except Exception:
        pass
    try:
        kind = jax.devices()[0].device_kind.lower()
        if "v7" in kind:
            return 64 * 1024 * 1024
        return 128 * 1024 * 1024
    except Exception:
        return 64 * 1024 * 1024  # most conservative (v7x)


def cust2_loss(prob_dist: jax.Array, *, block_rows: int | None = None) -> jax.Array:
    """Pallas TPU implementation of cust2.forward. Returns a scalar f32 loss."""
    assert prob_dist.ndim == 2, "prob_dist must be (batch_size, tag_size)"
    B, T = prob_dist.shape
    itemsize = jnp.dtype(prob_dist.dtype).itemsize

    # Explicit scoped-VMEM limit: v5e's 16 MiB / v7x's 32 MiB defaults are too
    # tight; physical is 128 MiB (v5e/v6e) or 64 MiB (v7x). Leave headroom.
    vmem_cap = _vmem_capacity_bytes()
    vmem_limit = int(min(vmem_cap * 3 // 4, 96 * 1024 * 1024))

    # Per-row VMEM cost: 2x double-buffered native-dtype input rows plus
    # ~2 full-block f32 temporaries (upcast xf, x*x) inside the kernel.
    per_row_bytes = T * (2 * itemsize + 2 * 4)
    row_budget = max((vmem_limit // 3) // max(per_row_bytes, 1), 8)

    if block_rows is None:
        if B <= row_budget:
            block_rows = B                               # single block, no mask
        else:
            block_rows = max(min((row_budget // 8) * 8, (B // 8) * 8), 8)
    # (8,128) rule: second-minor block dim must be a multiple of 8 or == B.
    assert block_rows == B or block_rows % 8 == 0, "block_rows must be %8==0 or ==B"

    num_blocks = pl.cdiv(B, block_rows)
    needs_mask = (B % block_rows) != 0

    kernel = functools.partial(
        _cust2_kernel,
        batch_size=B,
        block_rows=block_rows,
        needs_mask=needs_mask,
    )

    out = pl.pallas_call(
        kernel,
        out_shape=jax.ShapeDtypeStruct((1, 1), jnp.float32),
        grid=(num_blocks,),
        in_specs=[pl.BlockSpec((block_rows, T), lambda i: (i, 0))],
        out_specs=pl.BlockSpec((1, 1), lambda i: (0, 0)),
        scratch_shapes=[
            pltpu.VMEM((1, 1), jnp.float32),   # running sum of row maxes
            pltpu.VMEM((1, T), jnp.float32),   # running column sum of squares
        ],
        compiler_params=pltpu.CompilerParams(
            dimension_semantics=("arbitrary",),  # batch axis is a reduction
            vmem_limit_bytes=vmem_limit,
        ),
    )(prob_dist)
    return out[0, 0]


def cust2_loss_ref(prob_dist: jax.Array) -> jax.Array:
    """Pure-JAX reference for correctness check."""
    x = prob_dist.astype(jnp.float32)
    return jnp.sum(jnp.max(x, axis=1)) - jnp.max(jnp.sum(x * x, axis=0))


if __name__ == "__main__":
    key = jax.random.PRNGKey(0)

    # --- Case 1: small f32 input (single block path) ---
    batch_size, tag_size = 8, 16
    logits = jax.random.normal(key, (batch_size, tag_size), dtype=jnp.float32)
    prob_dist = jax.nn.softmax(logits, axis=-1)
    loss = jax.block_until_ready(cust2_loss(prob_dist))
    ref = cust2_loss_ref(prob_dist)
    assert jnp.allclose(loss, ref, rtol=1e-5, atol=1e-5), (loss, ref)

    # --- Case 2: bf16 input, upcast happens inside the kernel ---
    prob_bf16 = prob_dist.astype(jnp.bfloat16)
    loss_bf16 = jax.block_until_ready(cust2_loss(prob_bf16))
    ref_bf16 = cust2_loss_ref(prob_bf16)
    assert jnp.allclose(loss_bf16, ref_bf16, rtol=1e-3, atol=1e-3), (loss_bf16, ref_bf16)

    # --- Case 3: multi-block grid; masking only fires on the ragged last block ---
    key2 = jax.random.PRNGKey(0)
    logits2 = jax.random.normal(key2, (100, 64), dtype=jnp.float32)
    prob2 = jax.nn.softmax(logits2, axis=-1)
    loss2 = jax.block_until_ready(cust2_loss(prob2, block_rows=16))  # 100 % 16 != 0
    ref2 = cust2_loss_ref(prob2)
    assert jnp.allclose(loss2, ref2, rtol=1e-4, atol=1e-4), (loss2, ref2)

    print("KERNEL_OK")
</pallas_src>

<mosaic_0001>
module attributes {stable_mosaic.version = 11 : i64} {
  func.func @_cust2_kernel(%arg0: i32, %arg1: memref<8x16xf32, #tpu.memory_space<vmem>>, %arg2: memref<1x1xf32, #tpu.memory_space<vmem>>, %arg3: memref<1x1xf32, #tpu.memory_space<vmem>>, %arg4: memref<1x16xf32, #tpu.memory_space<vmem>>) attributes {dimension_semantics = [#tpu.dimension_semantics<arbitrary>], iteration_bounds = array<i64: 1>, scalar_prefetch = 0 : i64, scratch_operands = 2 : i64, tpu.core_type = #tpu.core_type<tc>, window_params = [{transform_indices = @transform_0, window_bounds = array<i64: 8, 16>}, {pipeline_mode = #tpu.pipeline_mode<synchronous>, transform_indices = @transform_1, window_bounds = array<i64: 1, 1>}]} {
    %c0_i32 = arith.constant 0 : i32
    %0 = arith.cmpi eq, %arg0, %c0_i32 : i32
    %1 = arith.extui %0 : i1 to i32
    %c0_i32_0 = arith.constant 0 : i32
    %2 = arith.cmpi ne, %1, %c0_i32_0 : i32
    scf.if %2 {
      %cst_14 = arith.constant 0.000000e+00 : f32
      %20 = vector.broadcast %cst_14 : f32 to vector<1x1xf32>
      %c0_15 = arith.constant 0 : index
      %c0_16 = arith.constant 0 : index
      %21 = vector.load %arg3[%c0_15, %c0_16] : memref<1x1xf32, #tpu.memory_space<vmem>>, vector<1x1xf32>
      tpu.vector_store %arg3[%c0_15, %c0_16], %20 {strides = array<i32>} : memref<1x1xf32, #tpu.memory_space<vmem>>, vector<1x1xf32>,
      %cst_17 = arith.constant 0.000000e+00 : f32
      %22 = vector.broadcast %cst_17 : f32 to vector<1x16xf32>
      %c0_18 = arith.constant 0 : index
      %c0_19 = arith.constant 0 : index
      %23 = vector.load %arg4[%c0_18, %c0_19] : memref<1x16xf32, #tpu.memory_space<vmem>>, vector<1x16xf32>
      tpu.vector_store %arg4[%c0_18, %c0_19], %22 {strides = array<i32>} : memref<1x16xf32, #tpu.memory_space<vmem>>, vector<1x16xf32>,
    } else {
    }
    %c0 = arith.constant 0 : index
    %c0_1 = arith.constant 0 : index
    %3 = vector.load %arg1[%c0, %c0_1] : memref<8x16xf32, #tpu.memory_space<vmem>>, vector<8x16xf32>
    %cst = arith.constant dense<0xFF800000> : vector<8xf32>
    %4 = vector.multi_reduction <maximumf>, %3, %cst [1] : vector<8x16xf32> to vector<8xf32>
    %5 = vector.shape_cast %4 : vector<8xf32> to vector<8x1xf32>
    %6 = arith.mulf %3, %3 : vector<8x16xf32>
    %c0_2 = arith.constant 0 : index
    %c0_3 = arith.constant 0 : index
    %7 = vector.load %arg3[%c0_2, %c0_3] : memref<1x1xf32, #tpu.memory_space<vmem>>, vector<1x1xf32>
    %cst_4 = arith.constant dense<0.000000e+00> : vector<1xf32>
    %8 = vector.multi_reduction <add>, %5, %cst_4 [0] : vector<8x1xf32> to vector<1xf32>
    %9 = vector.shape_cast %8 : vector<1xf32> to vector<1x1xf32>
    %10 = arith.addf %7, %9 : vector<1x1xf32>
    %c0_5 = arith.constant 0 : index
    %c0_6 = arith.constant 0 : index
    %11 = vector.load %arg3[%c0_5, %c0_6] : memref<1x1xf32, #tpu.memory_space<vmem>>, vector<1x1xf32>
    tpu.vector_store %arg3[%c0_5, %c0_6], %10 {strides = array<i32>} : memref<1x1xf32, #tpu.memory_space<vmem>>, vector<1x1xf32>,
    %c0_7 = arith.constant 0 : index
    %c0_8 = arith.constant 0 : index
    %12 = vector.load %arg4[%c0_7, %c0_8] : memref<1x16xf32, #tpu.memory_space<vmem>>, vector<1x16xf32>
    %cst_9 = arith.constant dense<0.000000e+00> : vector<16xf32>
    %13 = vector.multi_reduction <add>, %6, %cst_9 [0] : vector<8x16xf32> to vector<16xf32>
    %14 = vector.shape_cast %13 : vector<16xf32> to vector<1x16xf32>
    %15 = arith.addf %12, %14 : vector<1x16xf32>
    %c0_10 = arith.constant 0 : index
    %c0_11 = arith.constant 0 : index
    %16 = vector.load %arg4[%c0_10, %c0_11] : memref<1x16xf32, #tpu.memory_space<vmem>>, vector<1x16xf32>
    tpu.vector_store %arg4[%c0_10, %c0_11], %15 {strides = array<i32>} : memref<1x16xf32, #tpu.memory_space<vmem>>, vector<1x16xf32>,
    %c0_i32_12 = arith.constant 0 : i32
    %17 = arith.cmpi eq, %arg0, %c0_i32_12 : i32
    %18 = arith.extui %17 : i1 to i32
    %c0_i32_13 = arith.constant 0 : i32
    %19 = arith.cmpi ne, %18, %c0_i32_13 : i32
    scf.if %19 {
      %c0_14 = arith.constant 0 : index
      %c0_15 = arith.constant 0 : index
      %20 = vector.load %arg3[%c0_14, %c0_15] : memref<1x1xf32, #tpu.memory_space<vmem>>, vector<1x1xf32>
      %c0_16 = arith.constant 0 : index
      %c0_17 = arith.constant 0 : index
      %21 = vector.load %arg4[%c0_16, %c0_17] : memref<1x16xf32, #tpu.memory_space<vmem>>, vector<1x16xf32>
      %cst_18 = arith.constant dense<0xFF800000> : vector<1xf32>
      %22 = vector.multi_reduction <maximumf>, %21, %cst_18 [1] : vector<1x16xf32> to vector<1xf32>
      %23 = vector.shape_cast %22 : vector<1xf32> to vector<1x1xf32>
      %24 = arith.subf %20, %23 : vector<1x1xf32>
      %c0_19 = arith.constant 0 : index
      %c0_20 = arith.constant 0 : index
      %25 = vector.load %arg2[%c0_19, %c0_20] : memref<1x1xf32, #tpu.memory_space<vmem>>, vector<1x1xf32>
      tpu.vector_store %arg2[%c0_19, %c0_20], %24 {strides = array<i32>} : memref<1x1xf32, #tpu.memory_space<vmem>>, vector<1x1xf32>,
    } else {
    }
    return
  }
  func.func @transform_0(%arg0: i32) -> (i32, i32) {
    %c0_i32 = arith.constant 0 : i32
    %c0_i32_0 = arith.constant 0 : i32
    return %arg0, %c0_i32 : i32, i32
  }
  func.func @transform_1(%arg0: i32) -> (i32, i32) {
    %c0_i32 = arith.constant 0 : i32
    %c0_i32_0 = arith.constant 0 : i32
    %c0_i32_1 = arith.constant 0 : i32
    return %c0_i32, %c0_i32_0 : i32, i32
  }
}

</mosaic_0001>

<bundles_post_ra>
// kernel: tpu_custom_call.1
= control target key start
LH: loop header
LB: loop body
LE: loop exit
PB: predicated region body
PF: predicated region fallthrough
CT: control target
= control target key end

     0   :  { %6 = vsyncpa [#allocation5], 0  ;;  %s175_s0 = inlined_call_operand.hbm [shape: f32[8,16], index: 0, kind: input, shape index: {}]   ;;  %s176_s1 = inlined_call_operand.hbm [shape: f32[1,1], index: 1, kind: output, shape index: {}]  }
   0x1   :  { %7 = vsyncpa [#allocation6], 0  ;;  %s132_s6 = smov [#allocation4]   ;;  %s84_s10 = scalar_lea.hbm %s175_s0, 128 }
   0x2   :  { %s14_s7 = sshll.u32 %s132_s6, 4  ;;  %p85_p0 = scmp.ne.s32.totalorder %s175_s0, %s84_s10  ;;  %s15_s7 = int_to_ptr.vmem [resolvable:$true] %s14_s7 }
   0x3   :  { %p88_p1 = scmp.lt.u32.totalorder %s84_s10, %s175_s0 }
   0x5   :  { %p90_p2 = pnand %p88_p1, %p85_p0 }
   0x7   :  { %93 = shalt.err (!%p90_p2)
}
   0x8   :  { %s94_s15 = scalar_lea.vmem %s15_s7, 128  ;;  %p99_p4 = scmp.lt.s32.totalorder %s15_s7, %s15_s7 }
   0x9   :  { %p95_p3 = scmp.ne.s32.totalorder %s15_s7, %s94_s15  ;;  %p100_p5 = scmp.lt.s32.totalorder %s94_s15, %s94_s15 }
   0xb   :  { %p101_p6 = por %p100_p5, %p99_p4 }
   0xd   :  { %p102_p7 = pnand %p101_p6, %p95_p3 }
   0xf   :  { %105 = shalt.err (!%p102_p7)
}
  0x10   :  { %17 = dma.hbm_to_vmem [thread:$0]  %s175_s0, 128, %s15_s7, [#allocation5]  }
  0x11   :  { %128 = dma.done.wait [#allocation5], 128  }
  0x12   :  { %129 = vsyncadd [#allocation5], 4294967168  ;;  %vm27_vm0 = vcmask 122880   ;;  %v133_v0 = vmov 0.0   ;;  %vm30_vm1 = vcmask 130048   ;;  %v29_v1 = vld [vmem:[#allocation4] sm:$0xff] }
  0x13   :  { %28 = vst.msk [vmem:[#allocation3] sm:$0x1] %vm27_vm0, %v133_v0  ;;  %v31_v2 = vsel %vm30_vm1, %v29_v1, -inf  ;;  %v34_v3 = vmul.f32 %v29_v1, %v29_v1  ;;  %vm25_vm2 = vcmask 0   ;;  %s134_s0 = smov [#allocation7]  }
  0x14   :  { %32 = vmax.xlane.f32.xlu0 %v31_v2  ;;  %26 = vst.msk [vmem:[#allocation2] sm:$0x1] %vm25_vm2, %v133_v0  ;;  %s72_s18 = sshll.u32 %s134_s0, 4  ;;  %s73_s18 = int_to_ptr.vmem [resolvable:$true] %s72_s18 }
  0x15   :  { %v46_v4 = vsel %vm30_vm1, %v34_v3, 0.0  ;;  %s106_s19 = scalar_lea.vmem %s73_s18, 16  ;;  %s110_s20 = scalar_lea.vmem %s73_s18, 32 }
  0x16   :  { %v47_v5 = vrot.slane %v46_v4, 4  ;;  %p107_p8 = scmp.ne.s32.totalorder %s73_s18, %s106_s19  ;;  %p111_p9 = scmp.lt.s32.totalorder %s73_s18, %s73_s18 }
  0x17   :  { %p112_p10 = scmp.lt.s32.totalorder %s110_s20, %s106_s19 }
  0x18   :  { %v48_v6 = vadd.f32 %v47_v5, %v46_v4 }
  0x19   :  { %p113_p11 = por %p112_p10, %p111_p9 }
  0x1a   :  { %v49_v7 = vrot.slane %v48_v6, 2  ;;  %v45_v10 = vld [vmem:[#allocation3] sm:$0x1] }
  0x1b   :  { %v35_v21 = vld [vmem:[#allocation2] sm:$0x1]  ;;  %p114_p12 = pnand %p113_p11, %p107_p8 }
  0x1c   :  { %v50_v8 = vadd.f32 %v49_v7, %v48_v6 }
  0x1e   :  { %v51_v9 = vrot.slane %v50_v8, 1 }
  0x20   :  { %v52_v11 = vadd.f32 %v51_v9, %v50_v8 }
  0x22   :  { %v53_v12 = vadd.f32 %v52_v11, %v45_v10 }
  0x24   :  { %55 = vst.msk [vmem:[#allocation3] sm:$0x1] %vm27_vm0, %v53_v12 }
  0x2b   :  { %v60_v13 = vld [vmem:[#allocation3] sm:$0x1] }
  0x2c   :  { %v61_v14 = vsel %vm27_vm0, %v60_v13, -inf }
  0x2d   :  { %62 = vmax.xlane.f32.xlu0 %v61_v14 }
  0xa1   :  { %v33_v15 = vpop.xlane.xlu0 %32 }
  0xa2   :  { %v36_v16 = vrot.slane %v33_v15, 4 }
  0xa4   :  { %v37_v17 = vadd.f32 %v36_v16, %v33_v15 }
  0xa6   :  { %v38_v18 = vrot.slane %v37_v17, 2 }
  0xa8   :  { %v39_v19 = vadd.f32 %v38_v18, %v37_v17 }
  0xaa   :  { %v40_v20 = vrot.slane %v39_v19, 1 }
  0xac   :  { %v41_v22 = vadd.f32 %v40_v20, %v39_v19 }
  0xae   :  { %v42_v23 = vadd.f32 %v41_v22, %v35_v21 }
  0xb0   :  { %44 = vst.msk [vmem:[#allocation2] sm:$0x1] %vm25_vm2, %v42_v23 }
  0xb7   :  { %v59_v25 = vld [vmem:[#allocation2] sm:$0x1] }
  0xba   :  { %v63_v24 = vpop.xlane.xlu0 %62 }
  0xbb   :  { %v64_v26 = vsub.f32 %v59_v25, %v63_v24 }
  0xbd   :  { %65 = vst.msk [vmem:[#allocation7] sm:$0x1] %vm25_vm2, %v64_v26 }
  0xbe   :  { %117 = shalt.err (!%p114_p12)
}
  0xbf   :  { %s118_s23 = scalar_lea.hbm %s176_s1, 16 }
  0xc0   :  { %p119_p13 = scmp.ne.s32.totalorder %s176_s1, %s118_s23  ;;  %p122_p0 = scmp.lt.u32.totalorder %s118_s23, %s176_s1 }
  0xc2   :  { %p124_p1 = pnand %p122_p0, %p119_p13 }
  0xc4   :  { %127 = shalt.err (!%p124_p1)
}
  0xc5   :  { %75 = dma.vmem_to_hbm [thread:$0]  %s73_s18, 16, %s176_s1, [#allocation6]  }
  0xc6   :  { %130 = dma.done.wait [#allocation6], 16  }
  0xc7   :  { %131 = vsyncadd [#allocation6], 4294967280 }
  0xc8   :  { %79 = vsyncpa [#allocation5], 1 }
  0xc9   :  { %80 = vsyncpa [#allocation6], 1 }

</bundles_post_ra>
